<compile_context>
chip_gen: v7x
topology: tpu7x:2x2x1
jax: 0.10.0
libtpu: 0.0.40
codegen_flags: <defaults>
</compile_context>

<pallas_src>
import functools
import math

import jax
import jax.numpy as jnp
from jax.experimental import pallas as pl
from jax.experimental.pallas import tpu as pltpu

LANES = 128
SUBLANES = 8
CHUNK_ROWS = 64          # 64x128 f32 = 8 vregs per chunk / per accumulation chain group
MAX_BLOCK_ROWS = 8192    # (8192, 128) f32 = 4 MiB per pipeline buffer


def _round_up(x, m):
    return ((x + m - 1) // m) * m


def _wing_kernel(pred_ref, targ_ref, out_ref, acc_ref, *, omega, inv_eps, C,
                 inv_n, chunk_rows, n_chunks, block_rows, blocks_per_split,
                 valid_rows, needs_mask):
    # omega / inv_eps / C / inv_n are Python floats baked at trace time.
    split = pl.program_id(0)
    step = pl.program_id(1)

    @pl.when(step == 0)
    def _():
        acc_ref[...] = jnp.zeros_like(acc_ref)

    block_row0 = (split * blocks_per_split + step) * block_rows

    def wing(row0, p, t):
        d = jnp.abs(p.astype(jnp.float32) - t.astype(jnp.float32))
        # small branch: omega * log1p(d / eps); large branch: d - C
        loss = jnp.where(d < omega, omega * jnp.log1p(d * inv_eps), d - C)
        if needs_mask:
            # Rows past the true end of the array hold clamped-DMA garbage;
            # zero them (zero pads inside valid rows already contribute 0 loss).
            rid = row0 + jax.lax.broadcasted_iota(jnp.int32, loss.shape, 0)
            loss = jnp.where(rid < valid_rows, loss, 0.0)
        return loss

    if n_chunks == 1:
        block_acc = wing(block_row0, pred_ref[...], targ_ref[...])
    else:
        def body(c, carry):
            r0 = pl.multiple_of(c * chunk_rows, chunk_rows)
            return carry + wing(block_row0 + c * chunk_rows,
                                pred_ref[pl.ds(r0, chunk_rows), :],
                                targ_ref[pl.ds(r0, chunk_rows), :])

        block_acc = jax.lax.fori_loop(
            0, n_chunks, body,
            jnp.zeros((chunk_rows, LANES), jnp.float32), unroll=2)

    # Fold the (chunk_rows, 128) block sum onto the vreg-shaped accumulator
    # (pure VPU adds; one vreg add per grid step carried across the reduction).
    acc_ref[...] += block_acc.reshape(
        chunk_rows // SUBLANES, SUBLANES, LANES).sum(axis=0)

    @pl.when(step == pl.num_programs(1) - 1)
    def _():
        # Fused epilogue: cross-lane reduce once, scale by 1/N, emit a scalar.
        partial = jnp.sum(acc_ref[...], keepdims=True) * inv_n   # (1, 1)
        out_ref[...] = partial.reshape(1, 1, 1)


def wing_loss_3d(pred, target, omega=5.0, epsilon=2.0):
    """Pallas implementation of WingLoss3D.forward (mask=None path)."""
    # TODO(synk): boolean-mask indexing (loss[mask]) with a runtime mask is not
    # implemented; only the mask=None path of the reference module is covered.
    assert pred.shape == target.shape
    n_elems = int(pred.size)

    omega = float(omega)
    epsilon = float(epsilon)
    inv_eps = 1.0 / epsilon
    C = omega - omega * math.log(1.0 + omega / epsilon)
    inv_n = 1.0 / float(n_elems)

    # dtype-aware minimum sublane multiple (f32: 8, bf16: 16, int8/fp8: 32).
    itemsize = min(jnp.dtype(pred.dtype).itemsize, jnp.dtype(target.dtype).itemsize)
    min_sub = {4: 8, 2: 16, 1: 32}.get(itemsize, 8)

    # Lane-dense flatten (no copy for contiguous inputs with numel % 128 == 0).
    pred_f = pred.reshape(-1)
    targ_f = target.reshape(-1)
    rows = (n_elems + LANES - 1) // LANES
    rem = rows * LANES - n_elems
    if rem:
        # TODO(synk): a <128-element tail still pays a jnp.pad copy; only hit
        # when numel % 128 != 0 (never for typical NCHW feature maps).
        pred_f = jnp.pad(pred_f, (0, rem))
        targ_f = jnp.pad(targ_f, (0, rem))
    pred2d = pred_f.reshape(rows, LANES)
    targ2d = targ_f.reshape(rows, LANES)

    # Block geometry: no HBM padding — ragged last block is masked in-kernel.
    if rows <= CHUNK_ROWS:
        block_rows = _round_up(rows, min_sub)
    else:
        block_rows = min(_round_up(rows, CHUNK_ROWS), MAX_BLOCK_ROWS)
    num_blocks = (rows + block_rows - 1) // block_rows
    # Megacore split (v7x: 2 TCs). Only when blocks split evenly, so every
    # block index stays in range; serial (1-TC) execution is unaffected.
    nsplit = 2 if (num_blocks >= 2 and num_blocks % 2 == 0) else 1
    blocks_per_split = num_blocks // nsplit
    needs_mask = num_blocks * block_rows > rows
    chunk_rows = min(CHUNK_ROWS, block_rows)
    n_chunks = block_rows // chunk_rows

    kernel = functools.partial(
        _wing_kernel, omega=omega, inv_eps=inv_eps, C=C, inv_n=inv_n,
        chunk_rows=chunk_rows, n_chunks=n_chunks, block_rows=block_rows,
        blocks_per_split=blocks_per_split, valid_rows=rows,
        needs_mask=needs_mask)

    partials = pl.pallas_call(
        kernel,
        out_shape=jax.ShapeDtypeStruct((nsplit, 1, 1), jnp.float32),
        grid_spec=pltpu.PrefetchScalarGridSpec(
            num_scalar_prefetch=0,
            grid=(nsplit, blocks_per_split),
            in_specs=[
                pl.BlockSpec((block_rows, LANES),
                             lambda c, i: (c * blocks_per_split + i, 0)),
                pl.BlockSpec((block_rows, LANES),
                             lambda c, i: (c * blocks_per_split + i, 0)),
            ],
            # One scalar partial per split; constant across the reduction axis.
            out_specs=pl.BlockSpec((1, 1, 1), lambda c, i: (c, 0, 0)),
            scratch_shapes=[pltpu.VMEM((SUBLANES, LANES), jnp.float32)],
        ),
        compiler_params=pltpu.CompilerParams(
            dimension_semantics=("parallel", "arbitrary"),
            # 2 inputs x 2 pipeline buffers x 4 MiB = 16 MiB + headroom;
            # 32 MiB is safe on v5e/v6e (128 MiB) and v7x (64 MiB).
            vmem_limit_bytes=32 * 1024 * 1024,
        ),
    )(pred2d, targ2d)

    # nsplit (<=2) already-scaled scalars -> mean.
    return jnp.sum(partials)


def _reference(pred, target, omega=5.0, epsilon=2.0):
    d = jnp.abs(pred.astype(jnp.float32) - target.astype(jnp.float32))
    small = d < omega
    loss_small = omega * jnp.log(1.0 + d / epsilon) * small
    C = omega - omega * jnp.log(1.0 + omega / epsilon)
    loss_large = (d - C) * (d >= omega)
    return jnp.mean(loss_small + loss_large)


if __name__ == "__main__":
    key = jax.random.PRNGKey(0)
    k1, k2 = jax.random.split(key)
    shape = (2, 4, 16, 16)  # NCHW
    pred = jax.random.normal(k1, shape, dtype=jnp.float32) * 6.0
    target = jax.random.normal(k2, shape, dtype=jnp.float32) * 6.0

    out = wing_loss_3d(pred, target, omega=5.0, epsilon=2.0)
    out = jax.block_until_ready(out)

    ref = _reference(pred, target, omega=5.0, epsilon=2.0)
    assert jnp.allclose(out, ref, rtol=1e-5, atol=1e-5), (out, ref)
    print("KERNEL_OK")
</pallas_src>

<mosaic_0001>
module attributes {stable_mosaic.version = 11 : i64} {
  func.func @_wing_kernel(%arg0: i32, %arg1: i32, %arg2: memref<16x128xf32, #tpu.memory_space<vmem>>, %arg3: memref<16x128xf32, #tpu.memory_space<vmem>>, %arg4: memref<1x1x1xf32, #tpu.memory_space<vmem>>, %arg5: memref<8x128xf32, #tpu.memory_space<vmem>>) attributes {dimension_semantics = [#tpu.dimension_semantics<parallel>, #tpu.dimension_semantics<arbitrary>], iteration_bounds = array<i64: 1, 1>, scalar_prefetch = 0 : i64, scratch_operands = 1 : i64, tpu.core_type = #tpu.core_type<tc>, window_params = [{transform_indices = @transform_0, window_bounds = array<i64: 16, 128>}, {transform_indices = @transform_1, window_bounds = array<i64: 16, 128>}, {transform_indices = @transform_2, window_bounds = array<i64: 1, 1, 1>}]} {
    %c0_i32 = arith.constant 0 : i32
    %0 = arith.cmpi eq, %arg1, %c0_i32 : i32
    %1 = arith.extui %0 : i1 to i32
    %c0_i32_0 = arith.constant 0 : i32
    %2 = arith.cmpi ne, %1, %c0_i32_0 : i32
    scf.if %2 {
      %cst_14 = arith.constant 0.000000e+00 : f32
      %25 = vector.broadcast %cst_14 : f32 to vector<8x128xf32>
      %c0_15 = arith.constant 0 : index
      %c0_16 = arith.constant 0 : index
      %26 = vector.load %arg5[%c0_15, %c0_16] : memref<8x128xf32, #tpu.memory_space<vmem>>, vector<8x128xf32>
      tpu.vector_store %arg5[%c0_15, %c0_16], %25 {strides = array<i32>} : memref<8x128xf32, #tpu.memory_space<vmem>>, vector<8x128xf32>,
    } else {
    }
    %c0 = arith.constant 0 : index
    %c0_1 = arith.constant 0 : index
    %3 = vector.load %arg2[%c0, %c0_1] : memref<16x128xf32, #tpu.memory_space<vmem>>, vector<16x128xf32>
    %c0_2 = arith.constant 0 : index
    %c0_3 = arith.constant 0 : index
    %4 = vector.load %arg3[%c0_2, %c0_3] : memref<16x128xf32, #tpu.memory_space<vmem>>, vector<16x128xf32>
    %5 = arith.subf %3, %4 : vector<16x128xf32>
    %6 = math.absf %5 : vector<16x128xf32>
    %cst = arith.constant 5.000000e+00 : f32
    %7 = vector.broadcast %cst : f32 to vector<16x128xf32>
    %8 = arith.cmpf olt, %6, %7 : vector<16x128xf32>
    %cst_4 = arith.constant 5.000000e-01 : f32
    %9 = vector.broadcast %cst_4 : f32 to vector<16x128xf32>
    %10 = arith.mulf %6, %9 : vector<16x128xf32>
    %11 = math.log1p %10 : vector<16x128xf32>
    %cst_5 = arith.constant 5.000000e+00 : f32
    %12 = vector.broadcast %cst_5 : f32 to vector<16x128xf32>
    %13 = arith.mulf %12, %11 : vector<16x128xf32>
    %cst_6 = arith.constant -1.26381481 : f32
    %14 = vector.broadcast %cst_6 : f32 to vector<16x128xf32>
    %15 = arith.subf %6, %14 : vector<16x128xf32>
    %16 = arith.select %8, %13, %15 : vector<16x128xi1>, vector<16x128xf32>
    %c0_7 = arith.constant 0 : index
    %c0_8 = arith.constant 0 : index
    %17 = vector.load %arg5[%c0_7, %c0_8] : memref<8x128xf32, #tpu.memory_space<vmem>>, vector<8x128xf32>
    %18 = vector.shape_cast %16 : vector<16x128xf32> to vector<2x8x128xf32>
    %cst_9 = arith.constant dense<0.000000e+00> : vector<8x128xf32>
    %19 = vector.multi_reduction <add>, %18, %cst_9 [0] : vector<2x8x128xf32> to vector<8x128xf32>
    %20 = arith.addf %17, %19 : vector<8x128xf32>
    %c0_10 = arith.constant 0 : index
    %c0_11 = arith.constant 0 : index
    %21 = vector.load %arg5[%c0_10, %c0_11] : memref<8x128xf32, #tpu.memory_space<vmem>>, vector<8x128xf32>
    tpu.vector_store %arg5[%c0_10, %c0_11], %20 {strides = array<i32>} : memref<8x128xf32, #tpu.memory_space<vmem>>, vector<8x128xf32>,
    %c0_i32_12 = arith.constant 0 : i32
    %22 = arith.cmpi eq, %arg1, %c0_i32_12 : i32
    %23 = arith.extui %22 : i1 to i32
    %c0_i32_13 = arith.constant 0 : i32
    %24 = arith.cmpi ne, %23, %c0_i32_13 : i32
    scf.if %24 {
      %c0_14 = arith.constant 0 : index
      %c0_15 = arith.constant 0 : index
      %25 = vector.load %arg5[%c0_14, %c0_15] : memref<8x128xf32, #tpu.memory_space<vmem>>, vector<8x128xf32>
      %26 = vector.shape_cast %25 : vector<8x128xf32> to vector<1x8x128xf32>
      %cst_16 = arith.constant dense<0.000000e+00> : vector<1xf32>
      %27 = vector.multi_reduction <add>, %26, %cst_16 [1, 2] : vector<1x8x128xf32> to vector<1xf32>
      %28 = vector.shape_cast %27 : vector<1xf32> to vector<1x1x1xf32>
      %29 = vector.extract %28[0, 0, 0] : f32 from vector<1x1x1xf32>
      %30 = vector.broadcast %29 : f32 to vector<1x1xf32>
      %cst_17 = arith.constant 4.8828125E-4 : f32
      %31 = vector.broadcast %cst_17 : f32 to vector<1x1xf32>
      %32 = arith.mulf %30, %31 : vector<1x1xf32>
      %33 = vector.shape_cast %32 : vector<1x1xf32> to vector<1x1x1xf32>
      %c0_18 = arith.constant 0 : index
      %c0_19 = arith.constant 0 : index
      %c0_20 = arith.constant 0 : index
      %34 = vector.load %arg4[%c0_18, %c0_19, %c0_20] : memref<1x1x1xf32, #tpu.memory_space<vmem>>, vector<1x1x1xf32>
      tpu.vector_store %arg4[%c0_18, %c0_19, %c0_20], %33 {strides = array<i32>} : memref<1x1x1xf32, #tpu.memory_space<vmem>>, vector<1x1x1xf32>,
    } else {
    }
    return
  }
  func.func @transform_0(%arg0: i32, %arg1: i32) -> (i32, i32) {
    %c1_i32 = arith.constant 1 : i32
    %0 = arith.muli %arg0, %c1_i32 : i32
    %1 = arith.addi %0, %arg1 : i32
    %c0_i32 = arith.constant 0 : i32
    %c0_i32_0 = arith.constant 0 : i32
    return %1, %c0_i32 : i32, i32
  }
  func.func @transform_1(%arg0: i32, %arg1: i32) -> (i32, i32) {
    %c1_i32 = arith.constant 1 : i32
    %0 = arith.muli %arg0, %c1_i32 : i32
    %1 = arith.addi %0, %arg1 : i32
    %c0_i32 = arith.constant 0 : i32
    %c0_i32_0 = arith.constant 0 : i32
    return %1, %c0_i32 : i32, i32
  }
  func.func @transform_2(%arg0: i32, %arg1: i32) -> (i32, i32, i32) {
    %c0_i32 = arith.constant 0 : i32
    %c0_i32_0 = arith.constant 0 : i32
    %c0_i32_1 = arith.constant 0 : i32
    return %arg0, %c0_i32, %c0_i32_0 : i32, i32, i32
  }
}

</mosaic_0001>

<bundles_post_ra>
// kernel: tpu_custom_call.1
= control target key start
LH: loop header
LB: loop body
LE: loop exit
PB: predicated region body
PF: predicated region fallthrough
CT: control target
= control target key end

     0   :  { %7 = vsyncpa [#allocation4], 0  ;;  %s271_s0 = inlined_call_operand.hbm [shape: f32[16,128], index: 0, kind: input, shape index: {}]   ;;  %s272_s1 = inlined_call_operand.hbm [shape: f32[16,128], index: 1, kind: input, shape index: {}]   ;;  %s273_s2 = inlined_call_operand.hbm [shape: f32[1,1,1], index: 2, kind: output, shape index: {}]  }
   0x1   :  { %8 = vsyncpa [#allocation7], 0 }
   0x2   :  { %9 = vsyncpa [#allocation5], 0  ;;  %s215_s9 = smov [#allocation3]   ;;  %s143_s13 = scalar_lea.hbm %s271_s0, 256 }
   0x3   :  { %s19_s10 = sshll.u32 %s215_s9, 4  ;;  %p144_p0 = scmp.ne.s32.totalorder %s271_s0, %s143_s13  ;;  %s20_s10 = int_to_ptr.vmem [resolvable:$true] %s19_s10 }
   0x4   :  { %p147_p1 = scmp.lt.u32.totalorder %s143_s13, %s271_s0 }
   0x6   :  { %p149_p2 = pnand %p147_p1, %p144_p0 }
   0x8   :  { %152 = shalt.err (!%p149_p2)
}
   0x9   :  { %s153_s18 = scalar_lea.vmem %s20_s10, 256  ;;  %p158_p4 = scmp.lt.s32.totalorder %s20_s10, %s20_s10 }
   0xa   :  { %p154_p3 = scmp.ne.s32.totalorder %s20_s10, %s153_s18  ;;  %p159_p5 = scmp.lt.s32.totalorder %s153_s18, %s153_s18 }
   0xc   :  { %p160_p6 = por %p159_p5, %p158_p4 }
   0xe   :  { %p161_p7 = pnand %p160_p6, %p154_p3 }
  0x10   :  { %164 = shalt.err (!%p161_p7)
}
  0x11   :  { %s216_s19 = smov 128   ;;  %s217_s20 = smov 8  }
  0x12   :  { %25 = dma.hbm_to_vmem [thread:$0]  %s271_s0, 256, %s20_s10, [#allocation4], %s216_s19, %s216_s19, %s217_s20  }
  0x13   :  { %s218_s23 = smov [#allocation6]   ;;  %s165_s27 = scalar_lea.hbm %s272_s1, 256 }
  0x14   :  { %s35_s24 = sshll.u32 %s218_s23, 4  ;;  %p166_p8 = scmp.ne.s32.totalorder %s272_s1, %s165_s27  ;;  %s36_s24 = int_to_ptr.vmem [resolvable:$true] %s35_s24 }
  0x15   :  { %p169_p9 = scmp.lt.u32.totalorder %s165_s27, %s272_s1 }
  0x17   :  { %p171_p10 = pnand %p169_p9, %p166_p8 }
  0x19   :  { %174 = shalt.err (!%p171_p10)
}
  0x1a   :  { %s175_s4 = scalar_lea.vmem %s36_s24, 256  ;;  %p180_p12 = scmp.lt.s32.totalorder %s36_s24, %s36_s24 }
  0x1b   :  { %p176_p11 = scmp.ne.s32.totalorder %s36_s24, %s175_s4  ;;  %p181_p13 = scmp.lt.s32.totalorder %s175_s4, %s175_s4 }
  0x1d   :  { %p182_p0 = por %p181_p13, %p180_p12 }
  0x1f   :  { %p183_p1 = pnand %p182_p0, %p176_p11 }
  0x21   :  { %186 = shalt.err (!%p183_p1)
}
  0x22   :  { %41 = dma.hbm_to_vmem [thread:$0]  %s272_s1, 256, %s36_s24, [#allocation7], %s216_s19, %s216_s19, %s217_s20  }
  0x23   :  { %209 = dma.done.wait [#allocation4], 256  }
  0x24   :  { %210 = vsyncadd [#allocation4], 4294967040 }
  0x25   :  { %211 = dma.done.wait [#allocation7], 256  }
  0x26   :  { %212 = vsyncadd [#allocation7], 4294967040  ;;  %v57_v0 = vld [vmem:[#allocation3] sm:$0xff]  ;;  %v58_v1 = vld [vmem:[#allocation3 + $0x8] sm:$0xff]  ;;  %s219_s1 = smov [#allocation8]   ;;  %vm112_vm4 = vcmask 0  }
  0x27   :  { %v59_v2 = vld [vmem:[#allocation6] sm:$0xff]  ;;  %v60_v3 = vld [vmem:[#allocation6 + $0x8] sm:$0xff]  ;;  %s120_s6 = sshll.u32 %s219_s1, 4  ;;  %s121_s6 = int_to_ptr.vmem [resolvable:$true] %s120_s6 }
  0x28   :  { %v61_v4 = vsub.f32 %v57_v0, %v59_v2  ;;  %v62_v5 = vsub.f32 %v58_v1, %v60_v3  ;;  %s187_s8 = scalar_lea.vmem %s121_s6, 16  ;;  %s191_s9 = scalar_lea.vmem %s121_s6, 32 }
  0x29   :  { %p188_p2 = scmp.ne.s32.totalorder %s121_s6, %s187_s8  ;;  %p192_p3 = scmp.lt.s32.totalorder %s121_s6, %s121_s6 }
  0x2a   :  { %v63_v6 = vand.u32 2147483647, %v61_v4  ;;  %v64_v7 = vand.u32 2147483647, %v62_v5  ;;  %p193_p4 = scmp.lt.s32.totalorder %s191_s9, %s187_s8 }
  0x2c   :  { %v67_v8 = vmul.f32 0.5, %v63_v6  ;;  %v68_v9 = vmul.f32 0.5, %v64_v7  ;;  %v130_v24 = vadd.f32 1.2638148, %v63_v6  ;;  %vm65_vm2 = vcmp.lt.f32.partialorder %v63_v6, 5.0  ;;  %p194_p5 = por %p193_p4, %p192_p3 }
  0x2d   :  { %v131_v26 = vadd.f32 1.2638148, %v64_v7  ;;  %vm66_vm3 = vcmp.lt.f32.partialorder %v64_v7, 5.0 }
  0x2e   :  { %v69_v10 = vadd.f32 1.0, %v67_v8  ;;  %v78_v11 = vadd.f32 1.0, %v68_v9  ;;  %v72_v12 = vmul.f32 -0.5, %v67_v8  ;;  %v81_v13 = vmul.f32 -0.5, %v68_v9  ;;  %p195_p6 = pnand %p194_p5, %p188_p2 }
  0x2f   :  { %v75_v15 = vand.u32 2147483647, %v67_v8  ;;  %v84_v17 = vand.u32 2147483647, %v68_v9 }
  0x30   :  { %139 = vlog2.f32 %v69_v10  ;;  %v73_v14 = vadd.f32 1.0, %v72_v12  ;;  %v82_v16 = vadd.f32 1.0, %v81_v13 }
  0x31   :  { %141 = vlog2.f32 %v78_v11  ;;  %vm76_vm0 = vcmp.lt.f32.partialorder %v75_v15, 0.0004427343  ;;  %vm85_vm1 = vcmp.lt.f32.partialorder %v84_v17, 0.0004427343 }
  0x32   :  { %v74_v18 = vmul.f32 %v73_v14, %v67_v8  ;;  %v83_v20 = vmul.f32 %v82_v16, %v68_v9 }
  0x3a   :  { %v140_v19 = vpop.eup %139 }
  0x3b   :  { %v142_v21 = vpop.eup %141  ;;  %v71_v22 = vmul.f32 0.6931472, %v140_v19 }
  0x3c   :  { %v80_v23 = vmul.f32 0.6931472, %v142_v21 }
  0x3d   :  { %v77_v25 = vsel %vm76_vm0, %v74_v18, %v71_v22 }
  0x3e   :  { %v86_v27 = vsel %vm85_vm1, %v83_v20, %v80_v23  ;;  %v87_v28 = vmul.f32 5.0, %v77_v25 }
  0x3f   :  { %v88_v29 = vmul.f32 5.0, %v86_v27 }
  0x40   :  { %v91_v30 = vsel %vm65_vm2, %v87_v28, %v130_v24 }
  0x41   :  { %v92_v31 = vsel %vm66_vm3, %v88_v29, %v131_v26 }
  0x42   :  { %v94_v32 = vadd.f32 %v92_v31, %v91_v30 }
  0x44   :  { %101 = vadd.xlane.f32.xlu0 %v94_v32 }
  0xd1   :  { %v102_v33 = vpop.xlane.xlu0 %101 }
  0xd2   :  { %v103_v34 = vrot.slane %v102_v33, 4 }
  0xd4   :  { %v104_v35 = vadd.f32 %v103_v34, %v102_v33 }
  0xd6   :  { %v105_v36 = vrot.slane %v104_v35, 2 }
  0xd8   :  { %v106_v37 = vadd.f32 %v105_v36, %v104_v35 }
  0xda   :  { %v107_v38 = vrot.slane %v106_v37, 1 }
  0xdc   :  { %v108_v39 = vadd.f32 %v107_v38, %v106_v37 }
  0xde   :  { %132 = vpush %v108_v39 }
 0x10f   :  { %s133_s7 = spop %132 }
 0x110   :  { %v110_v40 = vstv %s133_s7 }
 0x111   :  { %v111_v41 = vmul.f32 0.00048828125, %v110_v40 }
 0x113   :  { %113 = vst.msk [vmem:[#allocation8] sm:$0x1] %vm112_vm4, %v111_v41 }
 0x114   :  { %198 = shalt.err (!%p195_p6)
}
 0x115   :  { %s199_s12 = scalar_lea.hbm %s273_s2, 16 }
 0x116   :  { %p200_p7 = scmp.ne.s32.totalorder %s273_s2, %s199_s12  ;;  %p203_p8 = scmp.lt.u32.totalorder %s199_s12, %s273_s2 }
 0x118   :  { %p205_p9 = pnand %p203_p8, %p200_p7 }
 0x11a   :  { %208 = shalt.err (!%p205_p9)
}
 0x11b   :  { %123 = dma.vmem_to_hbm [thread:$0]  %s121_s6, 16, %s273_s2, [#allocation5]  }
 0x11c   :  { %213 = dma.done.wait [#allocation5], 16  }
 0x11d   :  { %214 = vsyncadd [#allocation5], 4294967280 }
 0x11e   :  { %127 = vsyncpa [#allocation4], 1 }
 0x11f   :  { %128 = vsyncpa [#allocation7], 1 }
 0x120   :  { %129 = vsyncpa [#allocation5], 1 }

</bundles_post_ra>
